<compile_context>
chip_gen: v5e
topology: v5e:2x2
jax: 0.10.0
libtpu: 0.0.40
codegen_flags: <defaults>
</compile_context>

<pallas_src>
import math

import jax
import jax.numpy as jnp
import numpy as np
from jax.experimental import pallas as pl
from jax.experimental.pallas import tpu as pltpu

_LANE = 128


def _round_up(x, m):
    return ((x + m - 1) // m) * m


def _pad2d(x, rows, cols):
    r, c = x.shape
    if (r, c) == (rows, cols):
        return x
    return jnp.pad(x, ((0, rows - r), (0, cols - c)))


def _pick_tile(padded_dim, cap):
    """Largest multiple of 128 that divides `padded_dim` and is <= cap."""
    q = padded_dim // _LANE
    for t in range(min(q, cap // _LANE), 0, -1):
        if q % t == 0:
            return t * _LANE
    return _LANE


def _matmul_bias_kernel(a_ref, b_ref, bias_ref, out_ref, acc_ref):
    """One (tm, tn) output tile, accumulated over the K grid axis (axis 2)."""
    k = pl.program_id(2)

    @pl.when(k == 0)
    def _init():
        acc_ref[...] = jnp.zeros_like(acc_ref)

    acc_ref[...] += jnp.dot(a_ref[...], b_ref[...],
                            preferred_element_type=jnp.float32)

    @pl.when(k == pl.num_programs(2) - 1)
    def _finalize():
        out_ref[...] = (acc_ref[...] + bias_ref[...]).astype(out_ref.dtype)


def _matmul_padded(a, b, bias2d, out_dtype):
    """Tiled a @ b + bias2d. All shapes must already be multiples of 128."""
    m_p, k_p = a.shape
    k_p2, n_p = b.shape
    assert k_p == k_p2 and bias2d.shape == (1, n_p)

    tm = _pick_tile(m_p, 256)   # 128-aligned: good for v5e's 4x128x128 MXU too
    tn = _pick_tile(n_p, 256)
    tk = _pick_tile(k_p, 512)
    grid = (m_p // tm, n_p // tn, k_p // tk)

    a_bytes = jnp.dtype(a.dtype).itemsize
    b_bytes = jnp.dtype(b.dtype).itemsize
    o_bytes = jnp.dtype(out_dtype).itemsize
    # Double-buffered input/bias/output tiles + f32 accumulator, 2x headroom.
    vmem_needed = (2 * (tm * tk * a_bytes + tk * tn * b_bytes + tn * 4)
                   + 2 * tm * tn * o_bytes + tm * tn * 4)
    # Stay well under the 64 MiB physical VMEM of v7x.
    vmem_limit = min(max(2 * vmem_needed, 16 * 1024 * 1024), 48 * 1024 * 1024)

    cost = pl.CostEstimate(
        flops=2 * m_p * n_p * k_p,
        transcendentals=0,
        bytes_accessed=(m_p * k_p * a_bytes + k_p * n_p * b_bytes
                        + m_p * n_p * o_bytes + n_p * 4),
    )

    return pl.pallas_call(
        _matmul_bias_kernel,
        out_shape=jax.ShapeDtypeStruct((m_p, n_p), out_dtype),
        grid_spec=pltpu.PrefetchScalarGridSpec(
            num_scalar_prefetch=0,
            grid=grid,
            in_specs=[
                pl.BlockSpec((tm, tk), lambda i, j, k: (i, k)),
                pl.BlockSpec((tk, tn), lambda i, j, k: (k, j)),
                pl.BlockSpec((1, tn), lambda i, j, k: (0, j)),
            ],
            out_specs=pl.BlockSpec((tm, tn), lambda i, j, k: (i, j)),
            scratch_shapes=[pltpu.VMEM((tm, tn), jnp.float32)],
        ),
        compiler_params=pltpu.CompilerParams(
            dimension_semantics=("parallel", "parallel", "arbitrary"),
            vmem_limit_bytes=vmem_limit,
        ),
        cost_estimate=cost,
    )(a, b, bias2d)


def gc_layer(adj_matrix, feat_matrix, weights, bias):
    """Pallas equivalent of GCLayer.forward."""
    n_nodes = adj_matrix.shape[0]
    in_features, out_features = weights.shape

    # Lane-dense padded sizes (multiples of 128 everywhere).
    n_p = _round_up(n_nodes, _LANE)
    fin_p = _round_up(in_features, _LANE)
    fout_p = _round_up(out_features, _LANE)

    # bf16 operands at the boundary; kernels accumulate in f32.
    adj_p = _pad2d(adj_matrix.astype(jnp.bfloat16), n_p, n_p)
    feat_p = _pad2d(feat_matrix.astype(jnp.bfloat16), n_p, fin_p)
    w_p = _pad2d(weights.astype(jnp.bfloat16), fin_p, fout_p)
    bias_p = _pad2d(bias.reshape(1, out_features).astype(jnp.float32), 1, fout_p)

    if in_features <= out_features:
        # (adj @ feat) @ W + b  -- the N^2 matmul contracts/outputs over the
        # narrower F_in: up to 2x fewer MXU FLOPs than adj @ (feat @ W).
        zero_bias = jnp.zeros((1, fin_p), jnp.float32)
        agg = _matmul_padded(adj_p, feat_p, zero_bias, jnp.bfloat16)
        out_p = _matmul_padded(agg, w_p, bias_p, jnp.float32)
    else:
        # adj @ (feat @ W) + b  -- projection first when F_out < F_in.
        zero_bias = jnp.zeros((1, fout_p), jnp.float32)
        h = _matmul_padded(feat_p, w_p, zero_bias, jnp.bfloat16)
        out_p = _matmul_padded(adj_p, h, bias_p, jnp.float32)

    return out_p[:n_nodes, :out_features]


def init_gc_layer_params(key, in_features, out_features, bias=False):
    """Deterministic init matching GCLayer.__init__ semantics."""
    dist_bound = 1.0 / np.sqrt(out_features)
    w = jax.random.uniform(
        key, (in_features, out_features),
        minval=-dist_bound, maxval=dist_bound, dtype=jnp.float32)
    # bias=False in the module still adds a zeros tensor in forward().
    b = jnp.zeros((out_features,), dtype=jnp.float32)
    return w, b


if __name__ == "__main__":
    # Small shapes consistent with the module: 8 nodes, 16 -> 32 features.
    n_nodes, in_features, out_features = 8, 16, 32

    key = jax.random.PRNGKey(0)
    k_w, k_adj, k_feat = jax.random.split(key, 3)

    weights, bias = init_gc_layer_params(k_w, in_features, out_features, bias=False)

    # Symmetric dense adjacency and node features.
    adj_raw = jax.random.uniform(k_adj, (n_nodes, n_nodes), dtype=jnp.float32)
    adj_matrix = (adj_raw + adj_raw.T) / 2.0
    feat_matrix = jax.random.normal(k_feat, (n_nodes, in_features), dtype=jnp.float32)

    out = gc_layer(adj_matrix, feat_matrix, weights, bias)
    out = jax.block_until_ready(out)

    # Reference in plain JAX f32 (same math as torch.mm(adj, torch.mm(feat, W)) + b).
    # Tolerance accounts for bf16 operands / bf16 intermediate in the kernel path.
    ref = adj_matrix @ (feat_matrix @ weights) + bias
    np.testing.assert_allclose(np.asarray(out), np.asarray(ref), rtol=3e-2, atol=3e-2)

    print("KERNEL_OK")
</pallas_src>

<mosaic_0001>
module attributes {stable_mosaic.version = 11 : i64} {
  func.func @_matmul_bias_kernel(%arg0: i32, %arg1: i32, %arg2: i32, %arg3: memref<128x128xbf16, #tpu.memory_space<vmem>>, %arg4: memref<128x128xbf16, #tpu.memory_space<vmem>>, %arg5: memref<1x128xf32, #tpu.memory_space<vmem>>, %arg6: memref<128x128xbf16, #tpu.memory_space<vmem>>, %arg7: memref<128x128xf32, #tpu.memory_space<vmem>>) attributes {dimension_semantics = [#tpu.dimension_semantics<parallel>, #tpu.dimension_semantics<parallel>, #tpu.dimension_semantics<arbitrary>], iteration_bounds = array<i64: 1, 1, 1>, scalar_prefetch = 0 : i64, scratch_operands = 1 : i64, tpu.core_type = #tpu.core_type<tc>, window_params = [{transform_indices = @transform_0, window_bounds = array<i64: 128, 128>}, {transform_indices = @transform_1, window_bounds = array<i64: 128, 128>}, {transform_indices = @transform_2, window_bounds = array<i64: 1, 128>}, {transform_indices = @transform_3, window_bounds = array<i64: 128, 128>}]} {
    %c0_i32 = arith.constant 0 : i32
    %0 = arith.cmpi eq, %arg2, %c0_i32 : i32
    %1 = arith.extui %0 : i1 to i32
    %c0_i32_0 = arith.constant 0 : i32
    %2 = arith.cmpi ne, %1, %c0_i32_0 : i32
    scf.if %2 {
      %cst_10 = arith.constant 0.000000e+00 : f32
      %12 = vector.broadcast %cst_10 : f32 to vector<128x128xf32>
      %c0_11 = arith.constant 0 : index
      %c0_12 = arith.constant 0 : index
      %13 = vector.load %arg7[%c0_11, %c0_12] : memref<128x128xf32, #tpu.memory_space<vmem>>, vector<128x128xf32>
      tpu.vector_store %arg7[%c0_11, %c0_12], %12 {strides = array<i32>} : memref<128x128xf32, #tpu.memory_space<vmem>>, vector<128x128xf32>,
    } else {
    }
    %c0 = arith.constant 0 : index
    %c0_1 = arith.constant 0 : index
    %3 = vector.load %arg7[%c0, %c0_1] : memref<128x128xf32, #tpu.memory_space<vmem>>, vector<128x128xf32>
    %c0_2 = arith.constant 0 : index
    %c0_3 = arith.constant 0 : index
    %4 = vector.load %arg3[%c0_2, %c0_3] : memref<128x128xbf16, #tpu.memory_space<vmem>>, vector<128x128xbf16>
    %c0_4 = arith.constant 0 : index
    %c0_5 = arith.constant 0 : index
    %5 = vector.load %arg4[%c0_4, %c0_5] : memref<128x128xbf16, #tpu.memory_space<vmem>>, vector<128x128xbf16>
    %cst = arith.constant dense<0.000000e+00> : vector<128x128xf32>
    %6 = tpu.matmul %4, %5, %cst {dimension_numbers = #tpu.dot_dimension_numbers<[1], [0], [0], [1], [0, 0, 1, 1], [], []>} : vector<128x128xbf16>, vector<128x128xbf16>, vector<128x128xf32> -> vector<128x128xf32>
    %7 = arith.addf %3, %6 : vector<128x128xf32>
    %c0_6 = arith.constant 0 : index
    %c0_7 = arith.constant 0 : index
    %8 = vector.load %arg7[%c0_6, %c0_7] : memref<128x128xf32, #tpu.memory_space<vmem>>, vector<128x128xf32>
    tpu.vector_store %arg7[%c0_6, %c0_7], %7 {strides = array<i32>} : memref<128x128xf32, #tpu.memory_space<vmem>>, vector<128x128xf32>,
    %c0_i32_8 = arith.constant 0 : i32
    %9 = arith.cmpi eq, %arg2, %c0_i32_8 : i32
    %10 = arith.extui %9 : i1 to i32
    %c0_i32_9 = arith.constant 0 : i32
    %11 = arith.cmpi ne, %10, %c0_i32_9 : i32
    scf.if %11 {
      %c0_10 = arith.constant 0 : index
      %c0_11 = arith.constant 0 : index
      %12 = vector.load %arg7[%c0_10, %c0_11] : memref<128x128xf32, #tpu.memory_space<vmem>>, vector<128x128xf32>
      %c0_12 = arith.constant 0 : index
      %c0_13 = arith.constant 0 : index
      %13 = vector.load %arg5[%c0_12, %c0_13] : memref<1x128xf32, #tpu.memory_space<vmem>>, vector<1x128xf32>
      %14 = vector.broadcast %13 : vector<1x128xf32> to vector<128x128xf32>
      %15 = arith.addf %12, %14 : vector<128x128xf32>
      %16 = arith.truncf %15 : vector<128x128xf32> to vector<128x128xbf16>
      %c0_14 = arith.constant 0 : index
      %c0_15 = arith.constant 0 : index
      %17 = vector.load %arg6[%c0_14, %c0_15] : memref<128x128xbf16, #tpu.memory_space<vmem>>, vector<128x128xbf16>
      tpu.vector_store %arg6[%c0_14, %c0_15], %16 {strides = array<i32>} : memref<128x128xbf16, #tpu.memory_space<vmem>>, vector<128x128xbf16>,
    } else {
    }
    return
  }
  func.func @transform_0(%arg0: i32, %arg1: i32, %arg2: i32) -> (i32, i32) {
    %c0_i32 = arith.constant 0 : i32
    return %arg0, %arg2 : i32, i32
  }
  func.func @transform_1(%arg0: i32, %arg1: i32, %arg2: i32) -> (i32, i32) {
    %c0_i32 = arith.constant 0 : i32
    return %arg2, %arg1 : i32, i32
  }
  func.func @transform_2(%arg0: i32, %arg1: i32, %arg2: i32) -> (i32, i32) {
    %c0_i32 = arith.constant 0 : i32
    %c0_i32_0 = arith.constant 0 : i32
    return %c0_i32, %arg1 : i32, i32
  }
  func.func @transform_3(%arg0: i32, %arg1: i32, %arg2: i32) -> (i32, i32) {
    %c0_i32 = arith.constant 0 : i32
    return %arg0, %arg1 : i32, i32
  }
}

</mosaic_0001>

<bundles_post_ra>
// kernel: tpu_custom_call.1
= control target key start
LH: loop header
LB: loop body
LE: loop exit
PB: predicated region body
PF: predicated region fallthrough
CT: control target
= control target key end

     0   :  { %8 = vsyncpa [#allocation4], 0  ;;  %s664_s0 = inlined_call_operand.hbm [shape: bf16[128,128], index: 0, kind: input, shape index: {}]   ;;  %s665_s1 = inlined_call_operand.hbm [shape: bf16[128,128], index: 1, kind: input, shape index: {}]   ;;  %s666_s2 = inlined_call_operand.vmem [shape: f32[1,128], index: 2, kind: input, shape index: {}]   ;;  %s667_s3 = inlined_call_operand.hbm [shape: bf16[128,128], index: 3, kind: output, shape index: {}]  }
   0x1   :  { %9 = vsyncpa [#allocation7], 0 }
   0x2   :  { %10 = vsyncpa [#allocation5], 0  ;;  %s15_s14 = sshll.u32 %s664_s0, 4  ;;  %s618_s15 = smov [#allocation3]   ;;  %s16_s14 = int_to_ptr.hbm [resolvable:$true] %s15_s14 }
   0x3   :  { %s17_s16 = sshll.u32 %s618_s15, 4  ;;  %s28_s19 = sshll.u32 %s665_s1, 4  ;;  %s18_s16 = int_to_ptr.vmem [resolvable:$true] %s17_s16  ;;  %s29_s19 = int_to_ptr.hbm [resolvable:$true] %s28_s19 }
   0x4   :  { %s619_s20 = smov 64   ;;  %s620_s21 = smov 4  }
   0x5   :  { %23 = dma.hbm_to_vmem [thread:$0]  %s16_s14, 1024, %s18_s16, [#allocation4], %s619_s20, %s619_s20, %s620_s21  }
   0x6   :  { %s621_s22 = smov [#allocation6]  }
   0x7   :  { %s30_s23 = sshll.u32 %s621_s22, 4  ;;  %s31_s23 = int_to_ptr.vmem [resolvable:$true] %s30_s23 }
   0x8   :  { %36 = dma.hbm_to_vmem [thread:$0]  %s29_s19, 1024, %s31_s23, [#allocation7], %s619_s20, %s619_s20, %s620_s21  }
   0x9   :  { %612 = dma.done.wait [#allocation4], 1024  }
   0xa   :  { %613 = vsyncadd [#allocation4], 4294966272 }
   0xb   :  { %614 = dma.done.wait [#allocation7], 1024  }
   0xc   :  { %615 = vsyncadd [#allocation7], 4294966272  ;;  %v462_v0 = vld [vmem:[#allocation6 + $0x38] sm:$0xff]  ;;  %v461_v1 = vld [vmem:[#allocation6 + $0x30] sm:$0xff]  ;;  %s369_s27 = sshll.u32 %s667_s3, 4  ;;  %s370_s27 = int_to_ptr.hbm [resolvable:$true] %s369_s27 }
   0xd   :  { %211 = vmatpush.bf16.msra.mxu0 %v462_v0  ;;  %510 = vmatpush.bf16.msra.mxu1 %v462_v0  ;;  %v460_v2 = vld [vmem:[#allocation6 + $0x28] sm:$0xff]  ;;  %v459_v3 = vld [vmem:[#allocation6 + $0x20] sm:$0xff]  ;;  %v458_v4 = vld [vmem:[#allocation6 + $0x18] sm:$0xff] }
   0xe   :  { %511 = vmatpush.bf16.msra.mxu2 %v462_v0  ;;  %512 = vmatpush.bf16.msra.mxu3 %v462_v0  ;;  %v457_v5 = vld [vmem:[#allocation6 + $0x10] sm:$0xff]  ;;  %v456_v6 = vld [vmem:[#allocation6 + $0x8] sm:$0xff]  ;;  %v455_v7 = vld [vmem:[#allocation6] sm:$0xff] }
   0xf   :  { %v447_v8 = vld [vmem:[#allocation3] sm:$0xff]  ;;  %v449_v9 = vld [vmem:[#allocation3 + $0x10] sm:$0xff]  ;;  %v448_v12 = vld [vmem:[#allocation3 + $0x8] sm:$0xff] }
  0x10   :  { %v451_v10 = vld [vmem:[#allocation3 + $0x20] sm:$0xff]  ;;  %v453_v11 = vld [vmem:[#allocation3 + $0x30] sm:$0xff]  ;;  %v450_v13 = vld [vmem:[#allocation3 + $0x18] sm:$0xff] }
  0x11   :  { %212 = vmatpush.bf16.msra.mxu0 %v461_v1  ;;  %513 = vmatpush.bf16.msra.mxu1 %v461_v1  ;;  %v452_v14 = vld [vmem:[#allocation3 + $0x28] sm:$0xff]  ;;  %v454_v15 = vld [vmem:[#allocation3 + $0x38] sm:$0xff]  ;;  %v539_v18 = vld [vmem:[%s666_s2] ss:$0 sm:$0xff]  ;;  %s622_s2 = smov [#allocation8]  }
  0x12   :  { %514 = vmatpush.bf16.msra.mxu2 %v461_v1  ;;  %515 = vmatpush.bf16.msra.mxu3 %v461_v1  ;;  %s367_s24 = sshll.u32 %s622_s2, 4  ;;  %s368_s24 = int_to_ptr.vmem [resolvable:$true] %s367_s24 }
  0x15   :  { %213 = vmatpush.bf16.msra.mxu0 %v460_v2  ;;  %516 = vmatpush.bf16.msra.mxu1 %v460_v2 }
  0x16   :  { %517 = vmatpush.bf16.msra.mxu2 %v460_v2  ;;  %518 = vmatpush.bf16.msra.mxu3 %v460_v2 }
  0x19   :  { %214 = vmatpush.bf16.msra.mxu0 %v459_v3  ;;  %519 = vmatpush.bf16.msra.mxu1 %v459_v3 }
  0x1a   :  { %520 = vmatpush.bf16.msra.mxu2 %v459_v3  ;;  %521 = vmatpush.bf16.msra.mxu3 %v459_v3 }
  0x1d   :  { %215 = vmatpush.bf16.msra.mxu0 %v458_v4  ;;  %522 = vmatpush.bf16.msra.mxu1 %v458_v4 }
  0x1e   :  { %523 = vmatpush.bf16.msra.mxu2 %v458_v4  ;;  %524 = vmatpush.bf16.msra.mxu3 %v458_v4 }
  0x21   :  { %216 = vmatpush.bf16.msra.mxu0 %v457_v5  ;;  %525 = vmatpush.bf16.msra.mxu1 %v457_v5 }
  0x22   :  { %526 = vmatpush.bf16.msra.mxu2 %v457_v5  ;;  %527 = vmatpush.bf16.msra.mxu3 %v457_v5 }
  0x25   :  { %217 = vmatpush.bf16.msra.mxu0 %v456_v6  ;;  %528 = vmatpush.bf16.msra.mxu1 %v456_v6 }
  0x26   :  { %529 = vmatpush.bf16.msra.mxu2 %v456_v6  ;;  %530 = vmatpush.bf16.msra.mxu3 %v456_v6 }
  0x29   :  { %218 = vmatpush.bf16.msra.mxu0 %v455_v7  ;;  %531 = vmatpush.bf16.msra.mxu1 %v455_v7 }
  0x2a   :  { %532 = vmatpush.bf16.msra.mxu2 %v455_v7  ;;  %533 = vmatpush.bf16.msra.mxu3 %v455_v7 }
  0x2c   :  { %219 = vmatmul.bf16.vlgmr.msra.gmra.mxu0 %v447_v8  ;;  %229 = vmatmul.bf16.vlgmr.msra.gmra.mxu1 %v449_v9 }
  0x2d   :  { %239 = vmatmul.bf16.vlgmr.msra.gmra.mxu2 %v451_v10  ;;  %249 = vmatmul.bf16.vlgmr.msra.gmra.mxu3 %v453_v11 }
  0x3c   :  { %224 = vmatmul.bf16.gmra.mxu0 %v448_v12  ;;  %234 = vmatmul.bf16.gmra.mxu1 %v450_v13 }
  0x3d   :  { %244 = vmatmul.bf16.gmra.mxu2 %v452_v14  ;;  %254 = vmatmul.bf16.gmra.mxu3 %v454_v15 }
  0xa9   :  { %v220_v16 = vpop.f32.mrf.mxu0  ;;  %v230_v17 = vpop.f32.mrf.mxu1 }
  0xaa   :  { %v315_v23 = vadd.f32 %v539_v18, %v220_v16  ;;  %v319_v24 = vadd.f32 %v539_v18, %v230_v17 }
  0xb0   :  { %v240_v19 = vpop.f32.mrf.mxu2  ;;  %v250_v20 = vpop.f32.mrf.mxu3 }
  0xb1   :  { %v222_v21 = vpop.f32.mrf.mxu0  ;;  %v232_v22 = vpop.f32.mrf.mxu1  ;;  %v323_v31 = vadd.f32 %v539_v18, %v240_v19  ;;  %v327_v32 = vadd.f32 %v539_v18, %v250_v20 }
  0xb2   :  { %v316_v25 = vadd.f32 %v539_v18, %v222_v21  ;;  %v320_v26 = vadd.f32 %v539_v18, %v232_v22 }
  0xb4   :  { %v466_v27 = vpack.c.bf16 %v316_v25, %v315_v23  ;;  %v476_v28 = vpack.c.bf16 %v320_v26, %v319_v24 }
  0xb6   :  { %467 = vst [vmem:[#allocation8] sm:$0xff] %v466_v27  }
  0xb7   :  { %504 = vst [vmem:[#allocation8 + $0x10] sm:$0xff] %v476_v28  }
  0xb8   :  { %v242_v29 = vpop.f32.mrf.mxu2  ;;  %v252_v30 = vpop.f32.mrf.mxu3 }
  0xb9   :  { %v324_v33 = vadd.f32 %v539_v18, %v242_v29  ;;  %v328_v34 = vadd.f32 %v539_v18, %v252_v30  ;;  %v225_v35 = vpop.f32.mrf.mxu0  ;;  %v235_v36 = vpop.f32.mrf.mxu1 }
  0xba   :  { %v317_v43 = vadd.f32 %v539_v18, %v225_v35  ;;  %v321_v44 = vadd.f32 %v539_v18, %v235_v36 }
  0xbb   :  { %v486_v37 = vpack.c.bf16 %v324_v33, %v323_v31  ;;  %v496_v38 = vpack.c.bf16 %v328_v34, %v327_v32 }
  0xbd   :  { %506 = vst [vmem:[#allocation8 + $0x20] sm:$0xff] %v486_v37  }
  0xbe   :  { %508 = vst [vmem:[#allocation8 + $0x30] sm:$0xff] %v496_v38  }
  0xc0   :  { %v245_v39 = vpop.f32.mrf.mxu2  ;;  %v255_v40 = vpop.f32.mrf.mxu3 }
  0xc1   :  { %v227_v41 = vpop.f32.mrf.mxu0  ;;  %v237_v42 = vpop.f32.mrf.mxu1  ;;  %v325_v51 = vadd.f32 %v539_v18, %v245_v39  ;;  %v329_v52 = vadd.f32 %v539_v18, %v255_v40 }
  0xc2   :  { %v318_v45 = vadd.f32 %v539_v18, %v227_v41  ;;  %v322_v46 = vadd.f32 %v539_v18, %v237_v42 }
  0xc4   :  { %v471_v47 = vpack.c.bf16 %v318_v45, %v317_v43  ;;  %v481_v48 = vpack.c.bf16 %v322_v46, %v321_v44 }
  0xc6   :  { %503 = vst [vmem:[#allocation8 + $0x8] sm:$0xff] %v471_v47  }
  0xc7   :  { %505 = vst [vmem:[#allocation8 + $0x18] sm:$0xff] %v481_v48  }
  0xc8   :  { %v247_v49 = vpop.f32.mrf.mxu2  ;;  %v257_v50 = vpop.f32.mrf.mxu3 }
  0xc9   :  { %v326_v53 = vadd.f32 %v539_v18, %v247_v49  ;;  %v330_v54 = vadd.f32 %v539_v18, %v257_v50 }
  0xcb   :  { %v491_v55 = vpack.c.bf16 %v326_v53, %v325_v51  ;;  %v501_v56 = vpack.c.bf16 %v330_v54, %v329_v52 }
  0xcd   :  { %507 = vst [vmem:[#allocation8 + $0x28] sm:$0xff] %v491_v55  }
  0xce   :  { %509 = vst [vmem:[#allocation8 + $0x38] sm:$0xff] %v501_v56  }
  0xcf   :  { %375 = dma.vmem_to_hbm [thread:$0]  %s368_s24, 1024, %s370_s27, [#allocation5], %s619_s20, %s619_s20, %s620_s21  }
  0xd0   :  { %616 = dma.done.wait [#allocation5], 1024  }
  0xd1   :  { %617 = vsyncadd [#allocation5], 4294966272 }
  0xd2   :  { %380 = vsyncpa [#allocation4], 1 }
  0xd3   :  { %381 = vsyncpa [#allocation7], 1 }
  0xd4   :  { %382 = vsyncpa [#allocation5], 1 }

</bundles_post_ra>
